<compile_context>
chip_gen: v7x
topology: tpu7x:2x2x1
jax: 0.10.0
libtpu: 0.0.40
codegen_flags: <defaults>
</compile_context>

<pallas_src>
import functools
import math

import jax
import jax.numpy as jnp
from jax.experimental import pallas as pl
from jax.experimental.pallas import tpu as pltpu


# ---------------------------------------------------------------------------
# Kernel: one grid step == TB images (TB*N tokens) of the batch.
# ---------------------------------------------------------------------------
def _attention_kernel(num_heads, seq_len, compute_dtype, approx_softmax,
                      x_ref, wqkv_ref, bqkv_ref, wp_ref, bp_ref,
                      o_ref, ctx_ref):
    TBN, D = x_ref.shape
    H = num_heads
    N = seq_len
    TB = TBN // N
    hd = D // H

    x = x_ref[...].astype(compute_dtype)

    # --- fused QKV projection: one lane-dense (TBN, D) @ (D, 3D) matmul ----
    # (f32 accumulate; bias and the folded q-scale added in f32)
    qkv = jnp.dot(x, wqkv_ref[...], preferred_element_type=jnp.float32)
    qkv = qkv + bqkv_ref[...]                                   # (TBN, 3D)

    # --- per-head attention core, batched over the TB images ---------------
    for h in range(H):                     # H is small; big matmuls are outside
        c = h * hd
        q = qkv[:, c:c + hd].reshape(TB, N, hd).astype(compute_dtype)
        k = qkv[:, D + c:D + c + hd].reshape(TB, N, hd).astype(compute_dtype)
        v = qkv[:, 2 * D + c:2 * D + c + hd].reshape(TB, N, hd).astype(compute_dtype)

        # scores + softmax in f32 (scale already folded into q)
        s = jnp.einsum('bnd,bmd->bnm', q, k,
                       preferred_element_type=jnp.float32)      # (TB, N, N)
        s = s - jnp.max(s, axis=-1, keepdims=True)
        e = jnp.exp(s)
        denom = jnp.sum(e, axis=-1, keepdims=True)
        if approx_softmax:
            p = e * pl.reciprocal(denom, approx=True)           # EUP slot
        else:
            p = e / denom

        ctx = jnp.einsum('bnm,bmd->bnd', p.astype(compute_dtype), v,
                         preferred_element_type=jnp.float32)    # (TB, N, hd)
        # Write this head's context into the VMEM slab (head-major columns,
        # matching torch's transpose(1,2).reshape(B,N,C)).
        ctx_ref[:, c:c + hd] = ctx.reshape(TBN, hd)

    # --- fused output projection: one (TBN, D) @ (D, D) matmul -------------
    ctx_all = ctx_ref[...].astype(compute_dtype)
    out = jnp.dot(ctx_all, wp_ref[...], preferred_element_type=jnp.float32)
    o_ref[...] = (out + bp_ref[...]).astype(o_ref.dtype)


# ---------------------------------------------------------------------------
# Wrapper: batch-tiled grid, resident weights, lane-dense (B*N, D) I/O slab.
# ---------------------------------------------------------------------------
def attention_forward(x, params, *, num_heads, batch_tile=None,
                      compute_dtype=jnp.bfloat16, approx_softmax=True,
                      out_dtype=None):
    B, N, D = x.shape
    H = num_heads
    hd = D // H
    if out_dtype is None:
        out_dtype = x.dtype
    # Per-generation tile knob: halve for v7x (64 MiB VMEM), quarter for v5e.
    TB = batch_tile if batch_tile is not None else math.gcd(B, 8)
    assert B % TB == 0, (B, TB)

    x2 = x.reshape(B * N, D)
    itemsize = lambda dt: jnp.dtype(dt).itemsize

    # VMEM budget: 2x (double-buffered) I/O blocks + resident weights +
    # f32 temporaries (qkv slab, ctx slab, one head's score matrix).
    blk_io = TB * N * D * (itemsize(x2.dtype) + itemsize(out_dtype))
    w_bytes = sum(int(v.size) * itemsize(v.dtype) for v in params.values())
    tmp_bytes = TB * N * (3 * D + 2 * D + 2 * N) * 4
    est = 2 * blk_io + 2 * w_bytes + tmp_bytes
    vmem_limit = int(min(64 * 2**20, max(16 * 2**20, 2 * est)))

    flops = 2 * B * N * D * (3 * D) + 4 * B * H * N * N * hd + 2 * B * N * D * D
    bytes_accessed = B * N * D * (itemsize(x2.dtype) + itemsize(out_dtype)) + w_bytes
    cost = pl.CostEstimate(flops=int(flops),
                           transcendentals=int(B * H * N * N),
                           bytes_accessed=int(bytes_accessed))

    kern = functools.partial(_attention_kernel, H, N, compute_dtype, approx_softmax)

    out = pl.pallas_call(
        kern,
        out_shape=jax.ShapeDtypeStruct((B * N, D), out_dtype),
        grid=(B // TB,),
        in_specs=[
            pl.BlockSpec((TB * N, D), lambda i: (i, 0)),          # x tile
            pl.BlockSpec(params["wqkv"].shape, lambda i: (0, 0)),  # resident weights
            pl.BlockSpec(params["bqkv"].shape, lambda i: (0, 0)),
            pl.BlockSpec(params["wp"].shape, lambda i: (0, 0)),
            pl.BlockSpec(params["bp"].shape, lambda i: (0, 0)),
        ],
        out_specs=pl.BlockSpec((TB * N, D), lambda i: (i, 0)),
        scratch_shapes=[pltpu.VMEM((TB * N, D), jnp.float32)],     # ctx slab
        compiler_params=pltpu.CompilerParams(
            dimension_semantics=("parallel",),
            vmem_limit_bytes=vmem_limit),
        cost_estimate=cost,
    )(x2, params["wqkv"], params["bqkv"], params["wp"], params["bp"])
    return out.reshape(B, N, D)


# ---------------------------------------------------------------------------
# One-time parameter prep: torch-layout Attention weights -> fused, transposed
# layout with the softmax scale folded into the q columns; weights stored in
# the MXU operand dtype, biases kept in f32.
#   qkv_w: (3D, D)  qkv_b: (3D,) or None   proj_w: (D, D)   proj_b: (D,)
# ---------------------------------------------------------------------------
def prep_attention_params(qkv_w, qkv_b, proj_w, proj_b, *, scale,
                          param_dtype=jnp.bfloat16):
    D = qkv_w.shape[1]
    if qkv_b is None:                              # qkv_bias=False
        qkv_b = jnp.zeros((3 * D,), jnp.float32)

    wqkv = jnp.transpose(jnp.asarray(qkv_w, jnp.float32))        # (D, 3D), x @ w
    bqkv = jnp.asarray(qkv_b, jnp.float32)
    col_scale = jnp.concatenate([jnp.full((D,), scale, jnp.float32),
                                 jnp.ones((2 * D,), jnp.float32)])
    wqkv = wqkv * col_scale[None, :]
    bqkv = (bqkv * col_scale).reshape(1, 3 * D)

    wp = jnp.transpose(jnp.asarray(proj_w, jnp.float32))         # (D, D)
    bp = jnp.asarray(proj_b, jnp.float32).reshape(1, D)

    return dict(wqkv=wqkv.astype(param_dtype), bqkv=bqkv,
                wp=wp.astype(param_dtype), bp=bp)


# ---------------------------------------------------------------------------
# Pure-JAX reference mirroring the PyTorch Attention.forward exactly.
# ---------------------------------------------------------------------------
def attention_reference(x, qkv_w, qkv_b, proj_w, proj_b, *, num_heads, scale):
    B, N, C = x.shape
    qkv = x @ qkv_w.T + qkv_b
    qkv = qkv.reshape(B, N, 3, num_heads, C // num_heads).transpose(2, 0, 3, 1, 4)
    q, k, v = qkv[0], qkv[1], qkv[2]
    attn = jax.nn.softmax((q @ jnp.swapaxes(k, -2, -1)) * scale, axis=-1)
    out = (attn @ v).transpose(0, 2, 1, 3).reshape(B, N, C)
    return out @ proj_w.T + proj_b


if __name__ == "__main__":
    # Small shapes consistent with the module's forward: x is (B, N, C).
    B, N, D, H = 2, 8, 32, 4
    scale = (D // H) ** -0.5            # qk_scale=None -> head_dim ** -0.5

    key = jax.random.PRNGKey(0)
    kx, kqw, kqb, kpw, kpb = jax.random.split(key, 5)
    x = jax.random.normal(kx, (B, N, D), jnp.float32)
    std = D ** -0.5
    qkv_w = std * jax.random.normal(kqw, (3 * D, D), jnp.float32)   # torch (out, in)
    qkv_b = 0.1 * jax.random.normal(kqb, (3 * D,), jnp.float32)     # qkv_bias=True
    proj_w = std * jax.random.normal(kpw, (D, D), jnp.float32)
    proj_b = 0.1 * jax.random.normal(kpb, (D,), jnp.float32)

    with jax.default_matmul_precision("highest"):
        ref = attention_reference(x, qkv_w, qkv_b, proj_w, proj_b,
                                  num_heads=H, scale=scale)
    ref = jax.block_until_ready(ref)

    # 1) exact f32 path, batch-tiled grid of 2 steps -- tight correctness gate.
    params_f32 = prep_attention_params(qkv_w, qkv_b, proj_w, proj_b,
                                       scale=scale, param_dtype=jnp.float32)
    out_f32 = attention_forward(x, params_f32, num_heads=H, batch_tile=1,
                                compute_dtype=jnp.float32, approx_softmax=False,
                                out_dtype=jnp.float32)
    out_f32 = jax.block_until_ready(out_f32)
    assert out_f32.shape == (B, N, D), out_f32.shape
    err_f32 = float(jnp.max(jnp.abs(out_f32 - ref)))
    assert jnp.allclose(out_f32, ref, atol=5e-3, rtol=1e-2), err_f32

    # 2) bf16-weight / bf16-MXU + approx-softmax fast path (whole batch in one
    #    grid step) -- the v6e/v7x configuration.
    params_bf16 = prep_attention_params(qkv_w, qkv_b, proj_w, proj_b,
                                        scale=scale, param_dtype=jnp.bfloat16)
    out_bf16 = attention_forward(x, params_bf16, num_heads=H, batch_tile=2,
                                 compute_dtype=jnp.bfloat16, approx_softmax=True,
                                 out_dtype=jnp.float32)
    out_bf16 = jax.block_until_ready(out_bf16)
    assert out_bf16.shape == (B, N, D), out_bf16.shape
    err_bf16 = float(jnp.max(jnp.abs(out_bf16 - ref)))
    assert jnp.allclose(out_bf16, ref, atol=1e-1, rtol=1e-1), err_bf16

    print("KERNEL_OK")
</pallas_src>

<mosaic_0001>
module attributes {stable_mosaic.version = 11 : i64} {
  func.func @_attention_kernel(%arg0: i32, %arg1: memref<8x32xf32, #tpu.memory_space<vmem>>, %arg2: memref<32x96xf32, #tpu.memory_space<vmem>>, %arg3: memref<1x96xf32, #tpu.memory_space<vmem>>, %arg4: memref<32x32xf32, #tpu.memory_space<vmem>>, %arg5: memref<1x32xf32, #tpu.memory_space<vmem>>, %arg6: memref<8x32xf32, #tpu.memory_space<vmem>>, %arg7: memref<8x32xf32, #tpu.memory_space<vmem>>) attributes {dimension_semantics = [#tpu.dimension_semantics<parallel>], iteration_bounds = array<i64: 2>, scalar_prefetch = 0 : i64, scratch_operands = 1 : i64, tpu.core_type = #tpu.core_type<tc>, window_params = [{transform_indices = @transform_0, window_bounds = array<i64: 8, 32>}, {pipeline_mode = #tpu.pipeline_mode<synchronous>, transform_indices = @transform_1, window_bounds = array<i64: 32, 96>}, {pipeline_mode = #tpu.pipeline_mode<synchronous>, transform_indices = @transform_2, window_bounds = array<i64: 1, 96>}, {pipeline_mode = #tpu.pipeline_mode<synchronous>, transform_indices = @transform_3, window_bounds = array<i64: 32, 32>}, {pipeline_mode = #tpu.pipeline_mode<synchronous>, transform_indices = @transform_4, window_bounds = array<i64: 1, 32>}, {transform_indices = @transform_5, window_bounds = array<i64: 8, 32>}]} {
    %c0 = arith.constant 0 : index
    %c0_0 = arith.constant 0 : index
    %0 = vector.load %arg1[%c0, %c0_0] : memref<8x32xf32, #tpu.memory_space<vmem>>, vector<8x32xf32>
    %c0_1 = arith.constant 0 : index
    %c0_2 = arith.constant 0 : index
    %1 = vector.load %arg2[%c0_1, %c0_2] : memref<32x96xf32, #tpu.memory_space<vmem>>, vector<32x96xf32>
    %cst = arith.constant dense<0.000000e+00> : vector<8x96xf32>
    %2 = tpu.matmul %0, %1, %cst {dimension_numbers = #tpu.dot_dimension_numbers<[1], [0], [0], [1], [0, 0, 1, 1], [], []>} : vector<8x32xf32>, vector<32x96xf32>, vector<8x96xf32> -> vector<8x96xf32>
    %c0_3 = arith.constant 0 : index
    %c0_4 = arith.constant 0 : index
    %3 = vector.load %arg3[%c0_3, %c0_4] : memref<1x96xf32, #tpu.memory_space<vmem>>, vector<1x96xf32>
    %4 = vector.broadcast %3 : vector<1x96xf32> to vector<8x96xf32>
    %5 = arith.addf %2, %4 : vector<8x96xf32>
    %6 = vector.extract_strided_slice %5 {offsets = [0, 0], sizes = [8, 8], strides = [1, 1]} : vector<8x96xf32> to vector<8x8xf32>
    %7 = vector.shape_cast %6 : vector<8x8xf32> to vector<1x8x8xf32>
    %8 = vector.extract_strided_slice %5 {offsets = [0, 32], sizes = [8, 8], strides = [1, 1]} : vector<8x96xf32> to vector<8x8xf32>
    %9 = vector.shape_cast %8 : vector<8x8xf32> to vector<1x8x8xf32>
    %10 = vector.extract_strided_slice %5 {offsets = [0, 64], sizes = [8, 8], strides = [1, 1]} : vector<8x96xf32> to vector<8x8xf32>
    %11 = vector.shape_cast %10 : vector<8x8xf32> to vector<1x8x8xf32>
    "tpu.trace_start"() <{level = 10 : i32, message = "bnd,bmd->bnm"}> : () -> ()
    %cst_5 = arith.constant dense<0.000000e+00> : vector<1x8x8xf32>
    %12 = tpu.matmul %7, %9, %cst_5 {dimension_numbers = #tpu.dot_dimension_numbers<[2], [2], [1], [1], [0, 0, 0, 1, 1, 1], [0], [0]>} : vector<1x8x8xf32>, vector<1x8x8xf32>, vector<1x8x8xf32> -> vector<1x8x8xf32>
    "tpu.trace_stop"() : () -> ()
    %cst_6 = arith.constant dense<0xFF800000> : vector<1x8xf32>
    %13 = vector.multi_reduction <maximumf>, %12, %cst_6 [2] : vector<1x8x8xf32> to vector<1x8xf32>
    %14 = vector.shape_cast %13 : vector<1x8xf32> to vector<1x8x1xf32>
    %15 = vector.broadcast %14 : vector<1x8x1xf32> to vector<1x8x8xf32>
    %16 = arith.subf %12, %15 : vector<1x8x8xf32>
    %17 = math.exp %16 : vector<1x8x8xf32>
    %cst_7 = arith.constant dense<0.000000e+00> : vector<1x8xf32>
    %18 = vector.multi_reduction <add>, %17, %cst_7 [2] : vector<1x8x8xf32> to vector<1x8xf32>
    %19 = vector.shape_cast %18 : vector<1x8xf32> to vector<1x8x1xf32>
    %20 = vector.broadcast %19 : vector<1x8x1xf32> to vector<1x8x8xf32>
    %21 = arith.divf %17, %20 : vector<1x8x8xf32>
    "tpu.trace_start"() <{level = 10 : i32, message = "bnm,bmd->bnd"}> : () -> ()
    %cst_8 = arith.constant dense<0.000000e+00> : vector<1x8x8xf32>
    %22 = tpu.matmul %21, %11, %cst_8 {dimension_numbers = #tpu.dot_dimension_numbers<[2], [1], [1], [2], [0, 0, 0, 1, 1, 2], [0], [0]>} : vector<1x8x8xf32>, vector<1x8x8xf32>, vector<1x8x8xf32> -> vector<1x8x8xf32>
    "tpu.trace_stop"() : () -> ()
    %23 = vector.shape_cast %22 : vector<1x8x8xf32> to vector<8x8xf32>
    %c0_9 = arith.constant 0 : index
    %c0_10 = arith.constant 0 : index
    %24 = vector.load %arg7[%c0_9, %c0_10] : memref<8x32xf32, #tpu.memory_space<vmem>>, vector<8x8xf32>
    tpu.vector_store %arg7[%c0_9, %c0_10], %23 {strides = array<i32>} : memref<8x32xf32, #tpu.memory_space<vmem>>, vector<8x8xf32>,
    %25 = vector.extract_strided_slice %5 {offsets = [0, 8], sizes = [8, 8], strides = [1, 1]} : vector<8x96xf32> to vector<8x8xf32>
    %26 = vector.shape_cast %25 : vector<8x8xf32> to vector<1x8x8xf32>
    %27 = vector.extract_strided_slice %5 {offsets = [0, 40], sizes = [8, 8], strides = [1, 1]} : vector<8x96xf32> to vector<8x8xf32>
    %28 = vector.shape_cast %27 : vector<8x8xf32> to vector<1x8x8xf32>
    %29 = vector.extract_strided_slice %5 {offsets = [0, 72], sizes = [8, 8], strides = [1, 1]} : vector<8x96xf32> to vector<8x8xf32>
    %30 = vector.shape_cast %29 : vector<8x8xf32> to vector<1x8x8xf32>
    "tpu.trace_start"() <{level = 10 : i32, message = "bnd,bmd->bnm"}> : () -> ()
    %cst_11 = arith.constant dense<0.000000e+00> : vector<1x8x8xf32>
    %31 = tpu.matmul %26, %28, %cst_11 {dimension_numbers = #tpu.dot_dimension_numbers<[2], [2], [1], [1], [0, 0, 0, 1, 1, 1], [0], [0]>} : vector<1x8x8xf32>, vector<1x8x8xf32>, vector<1x8x8xf32> -> vector<1x8x8xf32>
    "tpu.trace_stop"() : () -> ()
    %cst_12 = arith.constant dense<0xFF800000> : vector<1x8xf32>
    %32 = vector.multi_reduction <maximumf>, %31, %cst_12 [2] : vector<1x8x8xf32> to vector<1x8xf32>
    %33 = vector.shape_cast %32 : vector<1x8xf32> to vector<1x8x1xf32>
    %34 = vector.broadcast %33 : vector<1x8x1xf32> to vector<1x8x8xf32>
    %35 = arith.subf %31, %34 : vector<1x8x8xf32>
    %36 = math.exp %35 : vector<1x8x8xf32>
    %cst_13 = arith.constant dense<0.000000e+00> : vector<1x8xf32>
    %37 = vector.multi_reduction <add>, %36, %cst_13 [2] : vector<1x8x8xf32> to vector<1x8xf32>
    %38 = vector.shape_cast %37 : vector<1x8xf32> to vector<1x8x1xf32>
    %39 = vector.broadcast %38 : vector<1x8x1xf32> to vector<1x8x8xf32>
    %40 = arith.divf %36, %39 : vector<1x8x8xf32>
    "tpu.trace_start"() <{level = 10 : i32, message = "bnm,bmd->bnd"}> : () -> ()
    %cst_14 = arith.constant dense<0.000000e+00> : vector<1x8x8xf32>
    %41 = tpu.matmul %40, %30, %cst_14 {dimension_numbers = #tpu.dot_dimension_numbers<[2], [1], [1], [2], [0, 0, 0, 1, 1, 2], [0], [0]>} : vector<1x8x8xf32>, vector<1x8x8xf32>, vector<1x8x8xf32> -> vector<1x8x8xf32>
    "tpu.trace_stop"() : () -> ()
    %42 = vector.shape_cast %41 : vector<1x8x8xf32> to vector<8x8xf32>
    %c0_15 = arith.constant 0 : index
    %c8 = arith.constant 8 : index
    %43 = vector.load %arg7[%c0_15, %c8] : memref<8x32xf32, #tpu.memory_space<vmem>>, vector<8x8xf32>
    tpu.vector_store %arg7[%c0_15, %c8], %42 {strides = array<i32>} : memref<8x32xf32, #tpu.memory_space<vmem>>, vector<8x8xf32>,
    %44 = vector.extract_strided_slice %5 {offsets = [0, 16], sizes = [8, 8], strides = [1, 1]} : vector<8x96xf32> to vector<8x8xf32>
    %45 = vector.shape_cast %44 : vector<8x8xf32> to vector<1x8x8xf32>
    %46 = vector.extract_strided_slice %5 {offsets = [0, 48], sizes = [8, 8], strides = [1, 1]} : vector<8x96xf32> to vector<8x8xf32>
    %47 = vector.shape_cast %46 : vector<8x8xf32> to vector<1x8x8xf32>
    %48 = vector.extract_strided_slice %5 {offsets = [0, 80], sizes = [8, 8], strides = [1, 1]} : vector<8x96xf32> to vector<8x8xf32>
    %49 = vector.shape_cast %48 : vector<8x8xf32> to vector<1x8x8xf32>
    "tpu.trace_start"() <{level = 10 : i32, message = "bnd,bmd->bnm"}> : () -> ()
    %cst_16 = arith.constant dense<0.000000e+00> : vector<1x8x8xf32>
    %50 = tpu.matmul %45, %47, %cst_16 {dimension_numbers = #tpu.dot_dimension_numbers<[2], [2], [1], [1], [0, 0, 0, 1, 1, 1], [0], [0]>} : vector<1x8x8xf32>, vector<1x8x8xf32>, vector<1x8x8xf32> -> vector<1x8x8xf32>
    "tpu.trace_stop"() : () -> ()
    %cst_17 = arith.constant dense<0xFF800000> : vector<1x8xf32>
    %51 = vector.multi_reduction <maximumf>, %50, %cst_17 [2] : vector<1x8x8xf32> to vector<1x8xf32>
    %52 = vector.shape_cast %51 : vector<1x8xf32> to vector<1x8x1xf32>
    %53 = vector.broadcast %52 : vector<1x8x1xf32> to vector<1x8x8xf32>
    %54 = arith.subf %50, %53 : vector<1x8x8xf32>
    %55 = math.exp %54 : vector<1x8x8xf32>
    %cst_18 = arith.constant dense<0.000000e+00> : vector<1x8xf32>
    %56 = vector.multi_reduction <add>, %55, %cst_18 [2] : vector<1x8x8xf32> to vector<1x8xf32>
    %57 = vector.shape_cast %56 : vector<1x8xf32> to vector<1x8x1xf32>
    %58 = vector.broadcast %57 : vector<1x8x1xf32> to vector<1x8x8xf32>
    %59 = arith.divf %55, %58 : vector<1x8x8xf32>
    "tpu.trace_start"() <{level = 10 : i32, message = "bnm,bmd->bnd"}> : () -> ()
    %cst_19 = arith.constant dense<0.000000e+00> : vector<1x8x8xf32>
    %60 = tpu.matmul %59, %49, %cst_19 {dimension_numbers = #tpu.dot_dimension_numbers<[2], [1], [1], [2], [0, 0, 0, 1, 1, 2], [0], [0]>} : vector<1x8x8xf32>, vector<1x8x8xf32>, vector<1x8x8xf32> -> vector<1x8x8xf32>
    "tpu.trace_stop"() : () -> ()
    %61 = vector.shape_cast %60 : vector<1x8x8xf32> to vector<8x8xf32>
    %c0_20 = arith.constant 0 : index
    %c16 = arith.constant 16 : index
    %62 = vector.load %arg7[%c0_20, %c16] : memref<8x32xf32, #tpu.memory_space<vmem>>, vector<8x8xf32>
    tpu.vector_store %arg7[%c0_20, %c16], %61 {strides = array<i32>} : memref<8x32xf32, #tpu.memory_space<vmem>>, vector<8x8xf32>,
    %63 = vector.extract_strided_slice %5 {offsets = [0, 24], sizes = [8, 8], strides = [1, 1]} : vector<8x96xf32> to vector<8x8xf32>
    %64 = vector.shape_cast %63 : vector<8x8xf32> to vector<1x8x8xf32>
    %65 = vector.extract_strided_slice %5 {offsets = [0, 56], sizes = [8, 8], strides = [1, 1]} : vector<8x96xf32> to vector<8x8xf32>
    %66 = vector.shape_cast %65 : vector<8x8xf32> to vector<1x8x8xf32>
    %67 = vector.extract_strided_slice %5 {offsets = [0, 88], sizes = [8, 8], strides = [1, 1]} : vector<8x96xf32> to vector<8x8xf32>
    %68 = vector.shape_cast %67 : vector<8x8xf32> to vector<1x8x8xf32>
    "tpu.trace_start"() <{level = 10 : i32, message = "bnd,bmd->bnm"}> : () -> ()
    %cst_21 = arith.constant dense<0.000000e+00> : vector<1x8x8xf32>
    %69 = tpu.matmul %64, %66, %cst_21 {dimension_numbers = #tpu.dot_dimension_numbers<[2], [2], [1], [1], [0, 0, 0, 1, 1, 1], [0], [0]>} : vector<1x8x8xf32>, vector<1x8x8xf32>, vector<1x8x8xf32> -> vector<1x8x8xf32>
    "tpu.trace_stop"() : () -> ()
    %cst_22 = arith.constant dense<0xFF800000> : vector<1x8xf32>
    %70 = vector.multi_reduction <maximumf>, %69, %cst_22 [2] : vector<1x8x8xf32> to vector<1x8xf32>
    %71 = vector.shape_cast %70 : vector<1x8xf32> to vector<1x8x1xf32>
    %72 = vector.broadcast %71 : vector<1x8x1xf32> to vector<1x8x8xf32>
    %73 = arith.subf %69, %72 : vector<1x8x8xf32>
    %74 = math.exp %73 : vector<1x8x8xf32>
    %cst_23 = arith.constant dense<0.000000e+00> : vector<1x8xf32>
    %75 = vector.multi_reduction <add>, %74, %cst_23 [2] : vector<1x8x8xf32> to vector<1x8xf32>
    %76 = vector.shape_cast %75 : vector<1x8xf32> to vector<1x8x1xf32>
    %77 = vector.broadcast %76 : vector<1x8x1xf32> to vector<1x8x8xf32>
    %78 = arith.divf %74, %77 : vector<1x8x8xf32>
    "tpu.trace_start"() <{level = 10 : i32, message = "bnm,bmd->bnd"}> : () -> ()
    %cst_24 = arith.constant dense<0.000000e+00> : vector<1x8x8xf32>
    %79 = tpu.matmul %78, %68, %cst_24 {dimension_numbers = #tpu.dot_dimension_numbers<[2], [1], [1], [2], [0, 0, 0, 1, 1, 2], [0], [0]>} : vector<1x8x8xf32>, vector<1x8x8xf32>, vector<1x8x8xf32> -> vector<1x8x8xf32>
    "tpu.trace_stop"() : () -> ()
    %80 = vector.shape_cast %79 : vector<1x8x8xf32> to vector<8x8xf32>
    %c0_25 = arith.constant 0 : index
    %c24 = arith.constant 24 : index
    %81 = vector.load %arg7[%c0_25, %c24] : memref<8x32xf32, #tpu.memory_space<vmem>>, vector<8x8xf32>
    tpu.vector_store %arg7[%c0_25, %c24], %80 {strides = array<i32>} : memref<8x32xf32, #tpu.memory_space<vmem>>, vector<8x8xf32>,
    %c0_26 = arith.constant 0 : index
    %c0_27 = arith.constant 0 : index
    %82 = vector.load %arg7[%c0_26, %c0_27] : memref<8x32xf32, #tpu.memory_space<vmem>>, vector<8x32xf32>
    %c0_28 = arith.constant 0 : index
    %c0_29 = arith.constant 0 : index
    %83 = vector.load %arg4[%c0_28, %c0_29] : memref<32x32xf32, #tpu.memory_space<vmem>>, vector<32x32xf32>
    %cst_30 = arith.constant dense<0.000000e+00> : vector<8x32xf32>
    %84 = tpu.matmul %82, %83, %cst_30 {dimension_numbers = #tpu.dot_dimension_numbers<[1], [0], [0], [1], [0, 0, 1, 1], [], []>} : vector<8x32xf32>, vector<32x32xf32>, vector<8x32xf32> -> vector<8x32xf32>
    %c0_31 = arith.constant 0 : index
    %c0_32 = arith.constant 0 : index
    %85 = vector.load %arg5[%c0_31, %c0_32] : memref<1x32xf32, #tpu.memory_space<vmem>>, vector<1x32xf32>
    %86 = vector.broadcast %85 : vector<1x32xf32> to vector<8x32xf32>
    %87 = arith.addf %84, %86 : vector<8x32xf32>
    %c0_33 = arith.constant 0 : index
    %c0_34 = arith.constant 0 : index
    %88 = vector.load %arg6[%c0_33, %c0_34] : memref<8x32xf32, #tpu.memory_space<vmem>>, vector<8x32xf32>
    tpu.vector_store %arg6[%c0_33, %c0_34], %87 {strides = array<i32>} : memref<8x32xf32, #tpu.memory_space<vmem>>, vector<8x32xf32>,
    return
  }
  func.func @transform_0(%arg0: i32) -> (i32, i32) {
    %c0_i32 = arith.constant 0 : i32
    %c0_i32_0 = arith.constant 0 : i32
    return %arg0, %c0_i32 : i32, i32
  }
  func.func @transform_1(%arg0: i32) -> (i32, i32) {
    %c0_i32 = arith.constant 0 : i32
    %c0_i32_0 = arith.constant 0 : i32
    %c0_i32_1 = arith.constant 0 : i32
    return %c0_i32, %c0_i32_0 : i32, i32
  }
  func.func @transform_2(%arg0: i32) -> (i32, i32) {
    %c0_i32 = arith.constant 0 : i32
    %c0_i32_0 = arith.constant 0 : i32
    %c0_i32_1 = arith.constant 0 : i32
    return %c0_i32, %c0_i32_0 : i32, i32
  }
  func.func @transform_3(%arg0: i32) -> (i32, i32) {
    %c0_i32 = arith.constant 0 : i32
    %c0_i32_0 = arith.constant 0 : i32
    %c0_i32_1 = arith.constant 0 : i32
    return %c0_i32, %c0_i32_0 : i32, i32
  }
  func.func @transform_4(%arg0: i32) -> (i32, i32) {
    %c0_i32 = arith.constant 0 : i32
    %c0_i32_0 = arith.constant 0 : i32
    %c0_i32_1 = arith.constant 0 : i32
    return %c0_i32, %c0_i32_0 : i32, i32
  }
  func.func @transform_5(%arg0: i32) -> (i32, i32) {
    %c0_i32 = arith.constant 0 : i32
    %c0_i32_0 = arith.constant 0 : i32
    return %arg0, %c0_i32 : i32, i32
  }
}

</mosaic_0001>

<bundles_post_ra>
// kernel: tpu_custom_call.1
= control target key start
LH: loop header
LB: loop body
LE: loop exit
PB: predicated region body
PF: predicated region fallthrough
CT: control target
= control target key end

     0   :  { %10 = vsyncpa [#allocation4], 0  ;;  %s1977_s0 = inlined_call_operand.hbm [shape: f32[16,32], index: 0, kind: input, shape index: {}]   ;;  %s1978_s1 = inlined_call_operand.hbm [shape: f32[32,96], index: 1, kind: input, shape index: {}]   ;;  %s1979_s2 = inlined_call_operand.vmem [shape: f32[1,96], index: 2, kind: input, shape index: {}]   ;;  %s1980_s3 = inlined_call_operand.hbm [shape: f32[32,32], index: 3, kind: input, shape index: {}]   ;;  %s1981_s4 = inlined_call_operand.vmem [shape: f32[1,32], index: 4, kind: input, shape index: {}]   ;;  %s1982_s5 = inlined_call_operand.hbm [shape: f32[16,32], index: 5, kind: output, shape index: {}]  }
   0x1   :  { %12 = vsyncpa [#allocation4 + $0x1], 0 }
   0x2   :  { %13 = vsyncpa [#allocation7], 0 }
   0x3   :  { %14 = vsyncpa [#allocation5], 0 }
   0x4   :  { %16 = vsyncpa [#allocation5 + $0x1], 0  ;;  %s1668_s18 = smov 0   ;;  %s1670_s19 = smov 0  }
   0x5   :  { %s1672_s20 = smov 0   ;;  %s1674_s21 = smov 0  }
   0x6 LB: > { %s1689_s22 = sadd.s32 4294967295, %s1613_s21   ;;  %s1223_s23 = sadd.s32 4294967294, %s1613_s21   ;;  %s1613_s21 = sphi %s1674_s21, %s2002_s21   ;;  %s1609_s20 = sphi %s1672_s20, %s2001_s20   ;;  %s1605_s19 = sphi %s1670_s19, %s2000_s19   ;;  %s1601_s18 = sphi %s1668_s18, %s1999_s18  }
   0x7   : > { %p42_p0 = scmp.ne.s32.totalorder %s1605_s19, %s1601_s18  ;;  %p1983_p1 = scmp.eq.s32.totalorder %s1689_s22, 0 }
   0x8   : > { %p156_p3 = scmp.eq.s32.totalorder %s1223_s23, 1  ;;  %p1224_p5 = scmp.ge.s32.totalorder %s1613_s21, 1 }
   0x9   : > { %p1698_p4 = por %p1983_p1, %p42_p0  ;;  %p163_p7 = scmp.lt.s32.totalorder %s1613_s21, 3 }
   0xa   : > { %p1703_p6 = por %p156_p3, %p42_p0  ;;  %s1615_s27 = smov [#allocation6]  }
   0xb   : > { %s1986_s24 = scalar_select %p1698_p4, 1, 0 }
   0xc   : > { %s1987_s25 = scalar_select %p1703_p6, 1, 0 }
   0xd   : > { %p1708_p8 = pnand %p1224_p5, %p163_p7  ;;  %s175_s28 = sshll.u32 %s1615_s27, 4  ;;  %s1712_s28 = int_to_ptr.vmem [resolvable:$true] %s175_s28 }
   0xe   : > { %s1616_s30 = smov [#allocation8]   ;;  %s1457_s9 = scalar_lea.hbm %s1978_s1, 512 }
   0xf   : > { %p1367_p9 = pneg %p1708_p8  ;;  %s191_s6 = sshll.u32 %s1616_s30, 4  ;;  %s1723_s6 = int_to_ptr.vmem [resolvable:$true] %s191_s6 }
  0x10   : > { %p1458_p12 = scmp.ne.s32.totalorder %s1978_s1, %s1457_s9  ;;  %p1464_p5 = scmp.lt.u32.totalorder %s1457_s9, %s1978_s1 }
  0x11   : > { %p1719_p11 = pnand %p1367_p9, %p1983_p1 }
  0x13   : > { %p1459_p13 = pneg %p1719_p11 }
  0x15   : > { %p1460_p0 = pnand %p1459_p13, %p1458_p12 }
  0x17   : > { %p1461_p3 = pneg %p1460_p0 }
  0x19   : > { %p1466_p7 = pnand %p1464_p5, %p1461_p3 }
  0x1b   : > { %1469 = shalt.err (!%p1466_p7)
}
  0x1c   : > { %s1470_s14 = scalar_lea.vmem %s1712_s28, 512  ;;  %p1478_p2 = scmp.lt.s32.totalorder %s1712_s28, %s1712_s28 }
  0x1d   : > { %p1471_p9 = scmp.ne.s32.totalorder %s1712_s28, %s1470_s14  ;;  %p1479_p12 = scmp.lt.s32.totalorder %s1470_s14, %s1470_s14 }
  0x1f   : > { %p1473_p10 = pnand %p1471_p9, %p1459_p13  ;;  %p1480_p0 = por %p1479_p12, %p1478_p2 }
  0x21   : > { %p1474_p1 = pneg %p1473_p10 }
  0x23   : > { %p1481_p6 = pnand %p1480_p0, %p1474_p1 }
  0x25   : > { %1484 = shalt.err (!%p1481_p6)
}
  0x26   : > { %s1617_s15 = smov 128   ;;  %s1618_s16 = smov 8  }
  0x27   : > { %1370 = dma.hbm_to_vmem [thread:$0]  (!%p1719_p11), %s1978_s1, 512, %s1712_s28, [#allocation7], %s1617_s15, %s1617_s15, %s1618_s16  }
  0x28   : > { %s1485_s7 = scalar_lea.hbm %s1980_s3, 512 }
  0x29   : > { %p1486_p2 = scmp.ne.s32.totalorder %s1980_s3, %s1485_s7  ;;  %p1492_p10 = scmp.lt.u32.totalorder %s1485_s7, %s1980_s3 }
  0x2b   : > { %p1488_p1 = pnand %p1486_p2, %p1459_p13 }
  0x2d   : > { %p1489_p6 = pneg %p1488_p1 }
  0x2f   : > { %p1494_p3 = pnand %p1492_p10, %p1489_p6 }
  0x31   : > { %1497 = shalt.err (!%p1494_p3)
}
  0x32   : > { %s1498_s28 = scalar_lea.vmem %s1723_s6, 512  ;;  %p1506_p12 = scmp.lt.s32.totalorder %s1723_s6, %s1723_s6 }
  0x33   : > { %p1499_p5 = scmp.ne.s32.totalorder %s1723_s6, %s1498_s28  ;;  %p1507_p0 = scmp.lt.s32.totalorder %s1498_s28, %s1498_s28 }
  0x35   : > { %p1501_p7 = pnand %p1499_p5, %p1459_p13  ;;  %p1508_p2 = por %p1507_p0, %p1506_p12 }
  0x37   : > { %p1502_p9 = pneg %p1501_p7 }
  0x39   : > { %p1509_p1 = pnand %p1508_p2, %p1502_p9 }
  0x3b   : > { %1512 = shalt.err (!%p1509_p1)
}
  0x3c   : > { %1373 = dma.hbm_to_vmem [thread:$0]  (!%p1719_p11), %s1980_s3, 512, %s1723_s6, [#allocation7], %s1617_s15, %s1617_s15, %s1618_s16  }
  0x3d   : > { %s1778_s14 = sadd.s32 1, %s1613_s21   ;;  %s29_s29 = sadd.s32 1, %s1609_s20 }
  0x3e   : > { %s26_s17 = ssub.s32 %s1613_s21, %s1778_s14  ;;  %p36_p13 = scmp.ne.s32.totalorder %s1609_s20, %s1605_s19 }
  0x3f   : > { %p27_p6 = scmp.eq.s32.totalorder %s26_s17, 0  ;;  %p37_p10 = scmp.eq.s32.totalorder %s1613_s21, 0 }
  0x40   : > { %p1990_p3 = scmp.eq.s32.totalorder %s1689_s22, 1  ;;  %p1384_p7 = scmp.lt.s32.totalorder %s1613_s21, 2 }
  0x41   : > { %s1794_s27 = scalar_select %p27_p6, %s1609_s20, %s29_s29  }
  0x42   : > { %p1788_p5 = por %p1990_p3, %p36_p13  ;;  %p38_p9 = por %p37_p10, %p36_p13 }
  0x43   : > { %s208_s30 = sand.u32 1, %s1609_s20   ;;  %s1229_s6 = sshll.u32 %s1613_s21, 7 }
  0x44   : > { %s1991_s23 = scalar_select %p1788_p5, 1, 0 }
  0x45   : > { %s1228_s7 = sshll.u32 %s208_s30, 3  ;;  %s1801_s8 = scalar_lea.hbm %s1977_s0, %s1229_s6 }
  0x46   : > { %s212_s9 = scalar_lea.vmem [#allocation3], %s1228_s7  ;;  %p1805_p11 = pnand %p1384_p7, %p38_p9 }
  0x47   : > { %s219_s10 = sshll.u32 %s212_s9, 4  ;;  %s209_s28 = scalar_lea.sflag [#allocation4], %s208_s30  ;;  %s1803_s10 = int_to_ptr.vmem [resolvable:$true] %s219_s10 }
  0x48   : > { %s1513_s12 = scalar_lea.hbm %s1801_s8, 128  ;;  %p1515_p0 = pneg %p1805_p11 }
  0x49   : > { %p1514_p12 = scmp.ne.s32.totalorder %s1801_s8, %s1513_s12  ;;  %s1518_s17 = scalar_lea.hbm %s1977_s0, 256 }
  0x4a   : > { %p1519_p13 = scmp.lt.u32.totalorder %s1801_s8, %s1977_s0  ;;  %p1520_p6 = scmp.lt.u32.totalorder %s1518_s17, %s1513_s12 }
  0x4b   : > { %p1516_p2 = pnand %p1515_p0, %p1514_p12  ;;  %p1522_p3 = scmp.lt.u32.totalorder %s1513_s12, %s1801_s8 }
  0x4c   : > { %p1521_p10 = por %p1520_p6, %p1519_p13 }
  0x4d   : > { %p1517_p1 = pneg %p1516_p2 }
  0x4e   : > { %p1523_p7 = por %p1522_p3, %p1521_p10 }
  0x50   : > { %p1524_p9 = pnand %p1523_p7, %p1517_p1 }
  0x52   : > { %1527 = shalt.err (!%p1524_p9)
}
  0x53   : > { %s1528_s30 = scalar_lea.vmem %s1803_s10, 128  ;;  %s1619_s15 = smov [#allocation3]  }
  0x54   : > { %p1529_p12 = scmp.ne.s32.totalorder %s1803_s10, %s1528_s30  ;;  %s1533_s16 = sshll.u32 %s1619_s15, 4  ;;  %s1534_s16 = int_to_ptr.vmem [resolvable:$false] %s1533_s16 }
  0x55   : > { %s1535_s9 = scalar_lea.vmem %s1534_s16, 256  ;;  %p1536_p4 = scmp.lt.s32.totalorder %s1803_s10, %s1534_s16 }
  0x56   : > { %p1531_p2 = pnand %p1529_p12, %p1515_p0  ;;  %p1537_p13 = scmp.lt.s32.totalorder %s1535_s9, %s1528_s30 }
  0x58   : > { %p1532_p5 = pneg %p1531_p2  ;;  %p1538_p6 = por %p1537_p13, %p1536_p4 }
  0x5a   : > { %p1539_p10 = pnand %p1538_p6, %p1532_p5 }
  0x5c   : > { %1542 = shalt.err (!%p1539_p10)
}
  0x5d   : > { %1377 = dma.hbm_to_vmem [thread:$0]  (!%p1805_p11), %s1801_s8, 128, %s1803_s10, %s209_s28  }
  0x5e   : > { %228 = sbr.rel (%p1708_p8) target bundleno = 2114 (0x842), region = 40  ;;  %s1837_s12 = sand.u32 (!%p1708_p8), 1, %s1605_s19  }
  0x5f   : > { %s1231_s13 = sshll.u32 (!%p1708_p8), %s1837_s12, 3  ;;  %s231_s29 = scalar_lea.sflag (!%p1708_p8), [#allocation4], %s1837_s12 }
  0x60   : > { %s234_s17 = scalar_lea.vmem (!%p1708_p8), [#allocation3], %s1231_s13  ;;  %p1993_p4 = scmp.ne.s32.totalorder (!%p1708_p8), %s1986_s24, 0 }
  0x65   : > { %1588 = dma.done.wait (%p1993_p4), %s231_s29, 128  }
  0x66   : > { %1590 = vsyncadd (%p1993_p4), %s231_s29, 4294967168  ;;  %p1994_p5 = scmp.eq.s32.totalorder %s1689_s22, 0 }
  0x68   : > { %1592 = dma.done.wait (%p1994_p5), [#allocation7], 1024   ;;  %p1995_p8 = pmov %p1994_p5 }
  0x69   : > { %v1620_v0 = vmov 0.0|0.0   ;;  %vm1621_vm0 = vmmov 0   ;;  %v1622_v1 = vmov 0.0   ;;  %v270_v2 = vld [vmem:[#allocation6] sm:$0xff]  ;;  %v271_v3 = vld [vmem:[#allocation6 + $0x8] sm:$0xff]  ;;  %v272_v4 = vld [vmem:[#allocation6 + $0x10] sm:$0xff] }
  0x6a   : > { %1594 = vsyncadd (%p1995_p8), [#allocation7], 4294966272  ;;  %1343 = vmatprep.subr.bf16.mxu0 %v1620_v0  ;;  %1289 = vmatprep.mubr.msk.f32.mxu0 %vm1621_vm0, %v1622_v1  ;;  %v1344_v5 = vpack.c.bf16 %v271_v3, %v270_v2  ;;  %v273_v6 = vld [vmem:[#allocation6 + $0x18] sm:$0xff]  ;;  %vm281_vm1 = vcmask 261120   ;;  %v1235_v9 = vld [vmem:[%s1979_s2] ss:$0 sm:$0xff] }
  0x6b   : > { %1292 = vmatprep.subr.mxu1 %v1622_v1  ;;  %1294 = vmatprep.mubr.msk.f32.mxu1 %vm1621_vm0, %v1622_v1  ;;  %v1347_v7 = vpack.c.bf16 %v273_v6, %v272_v4  ;;  %v269_v8 = vld [vmem:[%s234_s17] sm:$0xff]  ;;  %s1623_s8 = smov 64   ;;  %s1624_s10 = smov 96   ;;  %vm358_vm2 = vcmask 64512   ;;  %vm690_vm3 = vcmask 130112   ;;  %vm861_vm4 = vcmask 195712  }
  0x6c   : > { %1345 = vmatpush3.bf16.msra.mxu0 %v1344_v5  ;;  %s1625_s11 = smov 88   ;;  %s1626_s28 = smov 120   ;;  %vm1032_vm5 = vcmask 261312  }
  0x6d   : > { %1346 = vmatprep.subr.bf16.mxu0 %v1620_v0  ;;  %s1627_s7 = smov 80   ;;  %s1628_s6 = smov 72  }
  0x6e   : > { %s1629_s30 = smov 112   ;;  %s1630_s15 = smov 104  }
  0x6f   : > { %s1631_s16 = smov 56   ;;  %s1632_s9 = smov 48  }
  0x70   : > { %1348 = vmatpush3.bf16.msra.mxu0 %v1347_v7  ;;  %s1633_s29 = smov 40   ;;  %s1634_s17 = smov 8  }
  0x71   : > { %1312 = vmatprep.subr.mxu0 %v1622_v1  ;;  %s1635_s24 = smov 16   ;;  %s1636_s26 = smov 24  }
  0x72   : > { %p1996_p0 = scmp.ne.s32.totalorder %s1991_s23, 0 }
  0x73   : > { %1290 = vmatmul.mubr.msk.f32.vlgmr.msra.gmra.mrb[0].mxu0 %vm281_vm1, %v269_v8  ;;  %v1035_v8 = vld [vmem:[#allocation8] sm:$0xff] }
  0x74   : > { %1314 = vmatprep.mubr.msk.f32.mxu0 %vm1621_vm0, %v1622_v1 }
 0x146   : > { %v351_v10 = vpop.f32.mrb[0].mxu0 }
 0x147   : > { %v1865_v11 = vadd.f32 %v1235_v9, %v351_v10  ;;  %v1291_v12 = vpop.f32.mrb[1].mxu0  ;;  %v1036_v9 = vld [vmem:[#allocation8 + $0x8] sm:$0xff] }
 0x148   : > { %v1350_v10 = vpack.c.bf16 %v1036_v9, %v1035_v8  ;;  %v1038_v12 = vld [vmem:[#allocation8 + $0x18] sm:$0xff] }
 0x149   : > { %444 = vrot.lane.b32.xlu1 %v1865_v11, %s1623_s8  ;;  %356 = vrot.lane.b32.xlu0 %v1865_v11, %s1624_s10 }
 0x14d   : > { %523 = vrot.lane.b32.xlu1 %v1865_v11, %s1625_s11  ;;  %s1252_s11 = sshll.u32 %s1689_s22, 7 }
 0x151   : > { %521 = vrot.lane.b32.xlu1 %v1865_v11, %s1626_s28  ;;  %s268_s28 = scalar_lea.vmem [#allocation9], %s1231_s13  ;;  %s1637_s13 = smov [#allocation9]  }
 0x155   : > { %694 = vrot.lane.b32.xlu1 %v1865_v11, %s1627_s7  ;;  %s1134_s7 = sshll.u32 %s268_s28, 4  ;;  %s1934_s7 = int_to_ptr.vmem [resolvable:$true] %s1134_s7 }
 0x156   : > { %s1543_s22 = scalar_lea.vmem %s1934_s7, 128 }
 0x157   : > { %p1544_p11 = scmp.ne.s32.totalorder %s1934_s7, %s1543_s22 }
 0x159   : > { %p1545_p1 = pnand %p1544_p11, %p1996_p0 }
 0x15b   : > { %p1546_p3 = pneg %p1545_p1 }
 0x1bb   : > { %v445_v13 = vpop.permute.xlu1 %444  ;;  %v357_v14 = vpop.permute.xlu0 %356 }
 0x1bc   : > { %1293 = vmatpush3.xpose.msk.msra.mxu1 %vm358_vm2, %v357_v14 }
 0x1bd   : > { %1297 = vmatprep.subr.mxu1 %v1622_v1 }
 0x1bf   : > { %v524_v15 = vpop.permute.xlu1 %523  ;;  %1295 = vmatmul.mubr.msk.f32.vlgmr.msra.gmra.mrb[0].mxu1 %vm358_vm2, %v1865_v11 }
 0x1c0   : > { %1298 = vmatpush3.msra.mxu1 %v445_v13  ;;  %1299 = vmatprep.mubr.msk.f32.mxu1 %vm1621_vm0, %v1622_v1 }
 0x1c1   : > { %1302 = vmatprep.subr.mxu1 %v1622_v1 }
 0x1c3   : > { %v522_v16 = vpop.permute.xlu1 %521 }
 0x1c7   : > { %v695_v17 = vpop.permute.xlu1 %694 }
 0x1c8   : > { %1313 = vmatpush3.xpose.msk.msra.mxu0 %vm358_vm2, %v695_v17 }
 0x1c9   : > { %1322 = vmatprep.subr.mxu0 %v1622_v1 }
 0x292   : > { %v429_v18 = vpop.f32.mrb[0].mxu1 }
 0x293   : > { %v1296_v19 = vpop.f32.mrb[1].mxu1  ;;  %v433_v20 = vsel %vm358_vm2, %v429_v18, -inf }
 0x294   : > { %434 = vmax.xlane.f32.xlu0 %v433_v20 }
 0x2aa   : > { %865 = vrot.lane.b32.xlu0 %v1865_v11, %s1628_s6 }
 0x321   : > { %v435_v21 = vpop.xlane.xlu0 %434 }
 0x322   : > { %v436_v22 = vsub.f32 %v429_v18, %v435_v21 }
 0x324   : > { %v437_v23 = vmul.f32 1.442695, %v436_v22  ;;  %v1249_v22 = vld [vmem:[%s1981_s4] ss:$0 sm:$0xff] }
 0x325   : > { %v866_v28 = vpop.permute.xlu0 %865 }
 0x326   : > { %1441 = vpow2.f32 %v437_v23 }
 0x330   : > { %v1442_v24 = vpop.eup %1441 }
 0x331   : > { %v439_v25 = vsel %vm358_vm2, %v1442_v24, 0.0 }
 0x332   : > { %440 = vadd.xlane.f32.xlu1 %v439_v25 }
 0x343   : > { %692 = vrot.lane.b32.xlu1 %v1865_v11, %s1629_s30 }
 0x347   : > { %863 = vrot.lane.b32.xlu1 %v1865_v11, %s1630_s15  ;;  %s1932_s15 = scalar_lea.hbm %s1982_s5, %s1252_s11 }
 0x3bf   : > { %v441_v26 = vpop.xlane.xlu1 %440 }
 0x3c0   : > { %1443 = vrcp.f32 %v441_v26 }
 0x3c3   : > { %v693_v27 = vpop.permute.xlu1 %692 }
 0x3c4   : > { %1315 = vmatmul.mubr.msk.f32.vlgmr.msra.gmra.mrb[2].mxu0 %vm358_vm2, %v693_v27 }
 0x3c5   : > { %1323 = vmatpush3.xpose.msk.msra.mxu0 %vm358_vm2, %v866_v28  ;;  %1324 = vmatprep.mubr.msk.f32.mxu0 %vm1621_vm0, %v1622_v1 }
 0x3c6   : > { %1349 = vmatprep.subr.bf16.mxu0 %v1620_v0 }
 0x3c7   : > { %v864_v29 = vpop.permute.xlu1 %863 }
 0x3c8   : > { %1325 = vmatmul.mubr.msk.f32.vlgmr.msra.gmra.mrb[4].mxu0 %vm358_vm2, %v864_v29 }
 0x3c9   : > { %1340 = vmatprep.mubr.msk.f32.mxu0 %vm1621_vm0, %v1622_v1  ;;  %1351 = vmatpush3.bf16.msra.mxu0 %v1350_v10 }
 0x3ca   : > { %v1444_v30 = vpop.eup %1443  ;;  %1352 = vmatprep.subr.bf16.mxu0 %v1620_v0 }
 0x3cb   : > { %v443_v31 = vmul.f32 %v1444_v30, %v1442_v24 }
 0x3cd   : > { %1300 = vmatmul.mubr.msk.f32.vlgmr.msra.gmra.mrb[2].mxu1 %vm358_vm2, %v443_v31 }
 0x3ce   : > { %1303 = vmatpush3.xpose.msk.msra.mxu1 %vm358_vm2, %v524_v15  ;;  %1304 = vmatprep.mubr.msk.f32.mxu1 %vm1621_vm0, %v1622_v1 }
 0x3cf   : > { %1307 = vmatprep.subr.mxu1 %v1622_v1 }
 0x3d1   : > { %1305 = vmatmul.mubr.msk.f32.vlgmr.msra.gmra.mrb[4].mxu1 %vm358_vm2, %v522_v16 }
 0x3d2   : > { %1309 = vmatprep.mubr.msk.f32.mxu1 %vm1621_vm0, %v1622_v1 }
 0x497   : > { %v766_v32 = vpop.f32.mrb[2].mxu0 }
 0x498   : > { %v1316_v33 = vpop.f32.mrb[3].mxu0  ;;  %v770_v34 = vsel %vm358_vm2, %v766_v32, -inf }
 0x499   : > { %771 = vmax.xlane.f32.xlu0 %v770_v34 }
 0x49b   : > { %v937_v35 = vpop.f32.mrb[4].mxu0 }
 0x49c   : > { %v1326_v36 = vpop.f32.mrb[5].mxu0  ;;  %v941_v42 = vsel %vm358_vm2, %v937_v35, -inf }
 0x4a0   : > { %v516_v37 = vpop.f32.mrb[2].mxu1 }
 0x4a1   : > { %520 = vst.msk [vmem:[#allocation2] sm:$0xff] %vm358_vm2, %v516_v37  ;;  %v1301_v38 = vpop.f32.mrb[3].mxu1 }
 0x4a4   : > { %v595_v39 = vpop.f32.mrb[4].mxu1 }
 0x4a5   : > { %v1306_v40 = vpop.f32.mrb[5].mxu1  ;;  %v599_v41 = vsel %vm358_vm2, %v595_v39, -inf }
 0x4a6   : > { %600 = vmax.xlane.f32.xlu1 %v599_v41 }
 0x4aa   : > { %942 = vmax.xlane.f32.xlu1 %v941_v42 }
 0x526   : > { %v772_v43 = vpop.xlane.xlu0 %771 }
 0x527   : > { %v773_v44 = vsub.f32 %v766_v32, %v772_v43 }
 0x529   : > { %v774_v45 = vmul.f32 1.442695, %v773_v44 }
 0x52b   : > { %1445 = vpow2.f32 %v774_v45 }
 0x533   : > { %v601_v46 = vpop.xlane.xlu1 %600 }
 0x534   : > { %v602_v54 = vsub.f32 %v595_v39, %v601_v46 }
 0x535   : > { %v1446_v47 = vpop.eup %1445 }
 0x536   : > { %v776_v48 = vsel %vm358_vm2, %v1446_v47, 0.0  ;;  %v603_v55 = vmul.f32 1.442695, %v602_v54 }
 0x537   : > { %777 = vadd.xlane.f32.xlu1 %v776_v48  ;;  %v943_v49 = vpop.xlane.xlu1 %942 }
 0x538   : > { %v944_v50 = vsub.f32 %v937_v35, %v943_v49 }
 0x53a   : > { %v945_v51 = vmul.f32 1.442695, %v944_v50 }
 0x53c   : > { %1447 = vpow2.f32 %v945_v51 }
 0x53d   : > { %1449 = vpow2.f32 %v603_v55 }
 0x546   : > { %v1448_v52 = vpop.eup %1447 }
 0x547   : > { %v947_v53 = vsel %vm358_vm2, %v1448_v52, 0.0  ;;  %v1450_v56 = vpop.eup %1449 }
 0x548   : > { %610 = vrot.lane.b32.xlu1 %v1865_v11, %s1631_s16  ;;  %948 = vadd.xlane.f32.xlu0 %v947_v53  ;;  %v605_v57 = vsel %vm358_vm2, %v1450_v56, 0.0  ;;  %s1121_s16 = scalar_lea.sflag [#allocation5], %s1837_s12 }
 0x55e   : > { %781 = vrot.lane.b32.xlu0 %v1865_v11, %s1632_s9  ;;  %s1547_s9 = sshll.u32 %s1637_s13, 4  ;;  %s1548_s9 = int_to_ptr.vmem [resolvable:$false] %s1547_s9 }
 0x55f   : > { %p1550_p7 = scmp.lt.s32.totalorder %s1934_s7, %s1548_s9 }
 0x56c   : > { %606 = vadd.xlane.f32.xlu1 %v605_v57 }
 0x57d   : > { %952 = vrot.lane.b32.xlu1 %v1865_v11, %s1633_s29  ;;  %v1037_v11 = vld [vmem:[#allocation8 + $0x10] sm:$0xff]  ;;  %s1549_s29 = scalar_lea.vmem %s1548_s9, 256 }
 0x57e   : > { %v1353_v13 = vpack.c.bf16 %v1038_v12, %v1037_v11  ;;  %p1551_p9 = scmp.lt.s32.totalorder %s1549_s29, %s1543_s22 }
 0x580   : > { %1354 = vmatpush3.bf16.msra.mxu0 %v1353_v13  ;;  %p1552_p12 = por %p1551_p9, %p1550_p7 }
 0x582   : > { %p1553_p2 = pnand %p1552_p12, %p1546_p3 }
 0x5c4   : > { %v778_v58 = vpop.xlane.xlu1 %777 }
 0x5c8   : > { %v611_v59 = vpop.permute.xlu1 %610 }
 0x5c9   : > { %1308 = vmatpush3.msra.mxu1 %v611_v59 }
 0x5ca   : > { %1317 = vmatprep.subr.mxu1 %v1622_v1 }
 0x5d5   : > { %v949_v61 = vpop.xlane.xlu0 %948 }
 0x5d9   : > { %v782_v3 = vpop.permute.xlu0 %781 }
 0x5f9   : > { %v607_v60 = vpop.xlane.xlu1 %606 }
 0x5fa   : > { %1451 = vrcp.f32 %v607_v60 }
 0x5fb   : > { %1453 = vrcp.f32 %v778_v58 }
 0x5fc   : > { %1455 = vrcp.f32 %v949_v61 }
 0x5fd   : > { %v953_v6 = vpop.permute.xlu1 %952 }
 0x604   : > { %v1452_v62 = vpop.eup %1451 }
 0x605   : > { %v609_v63 = vmul.f32 %v1452_v62, %v1450_v56  ;;  %v1454_v2 = vpop.eup %1453 }
 0x606   : > { %v780_v4 = vmul.f32 %v1454_v2, %v1446_v47  ;;  %v1456_v5 = vpop.eup %1455 }
 0x607   : > { %1310 = vmatmul.mubr.msk.f32.vlgmr.msra.gmra.mrb[6].mxu1 %vm358_vm2, %v609_v63  ;;  %v951_v7 = vmul.f32 %v1456_v5, %v1448_v52 }
 0x608   : > { %1318 = vmatpush3.msra.mxu1 %v782_v3  ;;  %1319 = vmatprep.mubr.msk.f32.mxu1 %vm1621_vm0, %v1622_v1 }
 0x609   : > { %1327 = vmatprep.subr.mxu1 %v1622_v1 }
 0x60b   : > { %1320 = vmatmul.mubr.msk.f32.vlgmr.msra.gmra.mrb[8].mxu1 %vm358_vm2, %v780_v4 }
 0x60c   : > { %1328 = vmatpush3.msra.mxu1 %v953_v6  ;;  %1329 = vmatprep.mubr.msk.f32.mxu1 %vm1621_vm0, %v1622_v1 }
 0x60f   : > { %1330 = vmatmul.mubr.msk.f32.vlgmr.msra.gmra.mrb[10].mxu1 %vm358_vm2, %v951_v7 }
 0x6da   : > { %v682_v14 = vpop.f32.mrb[6].mxu1 }
 0x6db   : > { %687 = vrot.lane.b32.xlu1 %v682_v14, %s1634_s17  ;;  %v1311_v15 = vpop.f32.mrb[7].mxu1 }
 0x6de   : > { %v853_v16 = vpop.f32.mrb[8].mxu1 }
 0x6df   : > { %858 = vrot.lane.b32.xlu0 %v853_v16, %s1635_s24  ;;  %v1321_v1 = vpop.f32.mrb[9].mxu1 }
 0x6e2   : > { %v1024_v17 = vpop.f32.mrb[10].mxu1 }
 0x6e3   : > { %1029 = vrot.lane.b32.xlu1 %v1024_v17, %s1636_s26  ;;  %v1331_v18 = vpop.f32.mrb[11].mxu1 }
 0x74d   : > { %v688_v19 = vpop.permute.xlu1 %687 }
 0x74e   : > { %691 = vst.msk [vmem:[#allocation2] sm:$0xff] %vm690_vm3, %v688_v19 }
 0x751   : > { %v859_v0 = vpop.permute.xlu0 %858 }
 0x752   : > { %862 = vst.msk [vmem:[#allocation2] sm:$0xff] %vm861_vm4, %v859_v0 }
 0x755   : > { %v1030_v20 = vpop.permute.xlu1 %1029 }
 0x756   : > { %1033 = vst.msk [vmem:[#allocation2] sm:$0xff] %vm1032_vm5, %v1030_v20 }
 0x75d   : > { %v1034_v21 = vld [vmem:[#allocation2] sm:$0xff] }
 0x75e   : > { %1341 = vmatmul.mubr.msk.f32.vlgmr.msra.gmra.mrb[6].mxu0 %vm281_vm1, %v1034_v21 }
 0x831   : > { %v1115_v23 = vpop.f32.mrb[6].mxu0 }
 0x832   : > { %v1116_v24 = vadd.f32 %v1249_v22, %v1115_v23  ;;  %v1342_v25 = vpop.f32.mrb[7].mxu0 }
 0x834   : > { %1119 = vst.msk [vmem:[%s268_s28] sm:$0xff] %vm281_vm1, %v1116_v24 }
 0x835   : > { %1556 = shalt.err (!%p1553_p2)
}
 0x836   : > { %s1557_s12 = scalar_lea.hbm %s1932_s15, 128  ;;  %s1561_s26 = scalar_lea.hbm %s1982_s5, 256 }
 0x837   : > { %p1558_p13 = scmp.ne.s32.totalorder %s1932_s15, %s1557_s12  ;;  %p1562_p4 = scmp.lt.u32.totalorder %s1932_s15, %s1982_s5 }
 0x838   : > { %p1563_p5 = scmp.lt.u32.totalorder %s1561_s26, %s1557_s12  ;;  %p1565_p11 = scmp.lt.u32.totalorder %s1557_s12, %s1932_s15 }
 0x839   : > { %p1559_p6 = pnand %p1558_p13, %p1996_p0 }
 0x83a   : > { %p1564_p8 = por %p1563_p5, %p1562_p4 }
 0x83b   : > { %p1560_p10 = pneg %p1559_p6 }
 0x83c   : > { %p1566_p1 = por %p1565_p11, %p1564_p8 }
 0x83e   : > { %p1567_p3 = pnand %p1566_p1, %p1560_p10 }
 0x840   : > { %1570 = shalt.err (!%p1567_p3)
}
 0x841   : > { %1365 = dma.vmem_to_hbm [thread:$0]  (%p1996_p0), %s1934_s7, 128, %s1932_s15, %s1121_s16  }
 0x842 PF: > { %s1146_s11 = sand.u32 1, %s1601_s18   ;;  %p1997_p7 = scmp.ne.s32.totalorder %s1987_s25, 0 }
 0x843   : > { %p1998_p9 = scmp.ge.s32.totalorder %s1613_s21, 2  ;;  %s1147_s28 = scalar_lea.sflag [#allocation5], %s1146_s11 }
 0x845   : > { %p1379_p12 = pnand %p1998_p9, %p1997_p7 }
 0x847   : > { %1596 = dma.done.wait (!%p1379_p12), %s1147_s28, 128  }
 0x848   : > { %1598 = vsyncadd (!%p1379_p12), %s1147_s28, 4294967168  ;;  %p19_p2 = scmp.ge.s32.totalorder %s1778_s14, 4   ;;  %s1999_s18 = smov %s1605_s19 }
 0x849   : > { %s2000_s19 = smov %s1609_s20  ;;  %s2001_s20 = smov %s1794_s27 }
 0x84a   : > { %s2002_s21 = smov %s1778_s14  ;;  %21 = sbr.rel (!%p19_p2) target bundleno = 6 (0x6), region = 93 }
 0x851   :  { %1152 = vsyncpa [#allocation4], 1 }
 0x852   :  { %1154 = vsyncpa [#allocation4 + $0x1], 1 }
 0x853   :  { %1155 = vsyncpa [#allocation7], 1 }
 0x854   :  { %1156 = vsyncpa [#allocation5], 1 }
 0x855   :  { %1158 = vsyncpa [#allocation5 + $0x1], 1 }

</bundles_post_ra>
